<compile_context>
chip_gen: v5e
topology: v5e:2x2
jax: 0.10.0
libtpu: 0.0.40
codegen_flags: <defaults>
</compile_context>

<pallas_src>
import math
import jax
import jax.numpy as jnp
from jax.experimental import pallas as pl
from jax.experimental.pallas import tpu as pltpu

HEAD_DIM = 34
NUM_HEADS = 3
HEADS_PADDED = 128  # 3 * 34 = 102, zero-padded to a full 128-lane tile
HIDDEN = 256
IN_DIM = 512


def _multi_output_kernel(
    x_ref,       # (B, 512)   input features (post-backbone), f32
    w1_ref,      # (512, 256) bf16
    vec_ref,     # (4, 256)   f32: row0=b1, row1=gamma, row2=beta, row3=head bias (padded)
    wh_ref,      # (256, 128) bf16, fused + zero-padded heads
    o_ref,       # (B, 128)   lane-dense fused output, f32
):
    b1 = vec_ref[0:1, :]
    gamma = vec_ref[1:2, :]
    beta = vec_ref[2:3, :]
    bh = vec_ref[3:4, 0:HEADS_PADDED]

    # Linear(512 -> 256) + ReLU.  bf16 x bf16 on the MXU, f32 accumulation.
    x = x_ref[...].astype(jnp.bfloat16)
    h = jnp.dot(x, w1_ref[...], preferred_element_type=jnp.float32) + b1
    h = jnp.maximum(h, 0.0)

    # BatchNorm1d(256, eps=0.01), training mode: per-feature batch mean and
    # biased variance over this block's B rows.  One-pass variance
    # (E[h^2] - mean^2); mean folded into the shift to save a VPU pass.
    inv_b = 1.0 / x_ref.shape[0]
    mean = jnp.sum(h, axis=0, keepdims=True) * inv_b
    mean_sq = jnp.sum(h * h, axis=0, keepdims=True) * inv_b
    var = mean_sq - mean * mean
    scale = gamma * jax.lax.rsqrt(var + 0.01)
    shift = beta - mean * scale
    x1 = h * scale + shift

    # All three sigmoid heads fused: one bf16 MXU matmul (256 -> 128 padded),
    # one EUP sigmoid pass, one unmasked 128-lane-wide store.
    logits = (
        jnp.dot(x1.astype(jnp.bfloat16), wh_ref[...],
                preferred_element_type=jnp.float32)
        + bh
    )
    o_ref[...] = jax.nn.sigmoid(logits)


def _build_call(G, B):
    """pallas_call over G independent B-row BN groups; weights stay resident."""
    bytes_accessed = (
        IN_DIM * HIDDEN * 2                  # w1 (bf16)
        + HIDDEN * HEADS_PADDED * 2          # w_heads (bf16)
        + 4 * HIDDEN * 4                     # packed bias/BN vectors (f32)
        + G * B * IN_DIM * 4                 # x (f32)
        + G * B * HEADS_PADDED * 4           # fused output (f32)
    )
    cost = pl.CostEstimate(
        flops=2 * G * B * (IN_DIM * HIDDEN + HIDDEN * HEADS_PADDED),
        transcendentals=G * B * HEADS_PADDED,   # sigmoid
        bytes_accessed=bytes_accessed,
    )
    return pl.pallas_call(
        _multi_output_kernel,
        out_shape=jax.ShapeDtypeStruct((G * B, HEADS_PADDED), jnp.float32),
        grid_spec=pltpu.PrefetchScalarGridSpec(
            num_scalar_prefetch=0,
            grid=(G,),
            in_specs=[
                pl.BlockSpec((B, IN_DIM), lambda g: (g, 0)),            # x
                pl.BlockSpec((IN_DIM, HIDDEN), lambda g: (0, 0)),       # w1 (resident)
                pl.BlockSpec((4, HIDDEN), lambda g: (0, 0)),            # packed vecs
                pl.BlockSpec((HIDDEN, HEADS_PADDED), lambda g: (0, 0)), # w_heads
            ],
            out_specs=pl.BlockSpec((B, HEADS_PADDED), lambda g: (g, 0)),
        ),
        compiler_params=pltpu.CompilerParams(
            dimension_semantics=("parallel",),   # v7x: split groups across 2 TCs
        ),
        cost_estimate=cost,
    )


def multi_output_forward(x, params):
    """Single PyTorch-style forward: x is (B, 512); BN stats over the full batch."""
    B = x.shape[0]
    fused = _build_call(1, B)(x, params["w1"], params["vecs"], params["w_heads"])
    y1 = fused[:, 0 * HEAD_DIM:1 * HEAD_DIM]
    y2 = fused[:, 1 * HEAD_DIM:2 * HEAD_DIM]
    y3 = fused[:, 2 * HEAD_DIM:3 * HEAD_DIM]
    return y1, y2, y3


def multi_output_forward_grouped(xg, params):
    """Throughput path: xg is (G, B, 512) = G independent BN batches of B rows.

    Equivalent to calling the PyTorch module G times; the weights are DMA'd
    once and stay VMEM-resident across the grid, and the groups are split
    across TensorCores on v7x.  B must be a multiple of 8.
    """
    G, B, _ = xg.shape
    fused = _build_call(G, B)(
        xg.reshape(G * B, IN_DIM), params["w1"], params["vecs"], params["w_heads"]
    ).reshape(G, B, HEADS_PADDED)
    y1 = fused[:, :, 0 * HEAD_DIM:1 * HEAD_DIM]
    y2 = fused[:, :, 1 * HEAD_DIM:2 * HEAD_DIM]
    y3 = fused[:, :, 2 * HEAD_DIM:3 * HEAD_DIM]
    return y1, y2, y3


def _xavier_normal(key, fan_in, fan_out):
    # nn.init.xavier_normal_: std = sqrt(2 / (fan_in + fan_out))
    std = math.sqrt(2.0 / (fan_in + fan_out))
    # PyTorch Linear weight is (out, in); store transposed (in, out) for x @ W.
    return (std * jax.random.normal(key, (fan_out, fan_in), jnp.float32)).T


def _default_bias(key, fan_in, fan_out):
    # PyTorch Linear default bias init: U(-1/sqrt(fan_in), 1/sqrt(fan_in))
    bound = 1.0 / math.sqrt(fan_in)
    return jax.random.uniform(
        key, (1, fan_out), jnp.float32, minval=-bound, maxval=bound
    )


def init_params(key):
    ks = jax.random.split(key, 8)

    w1 = _xavier_normal(ks[0], IN_DIM, HIDDEN)       # (512, 256)
    b1 = _default_bias(ks[1], IN_DIM, HIDDEN)        # (1, 256)

    # Per-head Linear(256 -> 34) params, initialized exactly like PyTorch,
    # then packed into one lane-dense (256, 128) weight / (1, 128) bias.
    head_ws = [
        _xavier_normal(ks[2], HIDDEN, HEAD_DIM),
        _xavier_normal(ks[4], HIDDEN, HEAD_DIM),
        _xavier_normal(ks[6], HIDDEN, HEAD_DIM),
    ]
    head_bs = [
        _default_bias(ks[3], HIDDEN, HEAD_DIM),
        _default_bias(ks[5], HIDDEN, HEAD_DIM),
        _default_bias(ks[7], HIDDEN, HEAD_DIM),
    ]
    pad = HEADS_PADDED - NUM_HEADS * HEAD_DIM
    w_heads = jnp.concatenate(
        head_ws + [jnp.zeros((HIDDEN, pad), jnp.float32)], axis=1
    )  # (256, 128)
    b_heads = jnp.concatenate(
        head_bs + [jnp.zeros((1, pad), jnp.float32)], axis=1
    )  # (1, 128)

    # BatchNorm1d default affine init: gamma = 1, beta = 0.  Pack all small
    # row vectors into one (4, 256) f32 operand: one DMA, one padded tile.
    gamma = jnp.ones((1, HIDDEN), jnp.float32)
    beta = jnp.zeros((1, HIDDEN), jnp.float32)
    b_heads_256 = jnp.pad(b_heads, ((0, 0), (0, HIDDEN - HEADS_PADDED)))
    vecs = jnp.concatenate([b1, gamma, beta, b_heads_256], axis=0)  # (4, 256)

    return {
        "w1": w1.astype(jnp.bfloat16),
        "w_heads": w_heads.astype(jnp.bfloat16),
        "vecs": vecs,  # f32: biases / BN affine stay full precision
    }


if __name__ == "__main__":
    key = jax.random.PRNGKey(0)
    k_params, k_x, k_xg = jax.random.split(key, 3)

    B = 8  # batch size (>1 required by BatchNorm1d training semantics)
    params = init_params(k_params)

    # Single-batch path (matches one PyTorch forward call).
    x = jax.random.normal(k_x, (B, IN_DIM), jnp.float32)  # post-backbone features
    y1, y2, y3 = jax.jit(multi_output_forward)(x, params)
    jax.block_until_ready((y1, y2, y3))
    assert y1.shape == (B, HEAD_DIM)
    assert y2.shape == (B, HEAD_DIM)
    assert y3.shape == (B, HEAD_DIM)
    for y in (y1, y2, y3):
        assert bool(jnp.all(jnp.isfinite(y)))
        assert bool(jnp.all((y >= 0.0) & (y <= 1.0)))

    # Grouped (weight-resident, TC-parallel) path: G independent BN batches.
    G = 4
    xg = jax.random.normal(k_xg, (G, B, IN_DIM), jnp.float32)
    g1, g2, g3 = jax.jit(multi_output_forward_grouped)(xg, params)
    jax.block_until_ready((g1, g2, g3))
    assert g1.shape == (G, B, HEAD_DIM)
    assert g2.shape == (G, B, HEAD_DIM)
    assert g3.shape == (G, B, HEAD_DIM)
    for y in (g1, g2, g3):
        assert bool(jnp.all(jnp.isfinite(y)))
        assert bool(jnp.all((y >= 0.0) & (y <= 1.0)))

    # Group 0 of the grouped path must match a standalone forward on the same rows.
    r1, r2, r3 = jax.jit(multi_output_forward)(xg[0], params)
    assert bool(jnp.allclose(r1, g1[0], atol=1e-6))
    assert bool(jnp.allclose(r2, g2[0], atol=1e-6))
    assert bool(jnp.allclose(r3, g3[0], atol=1e-6))

    print("KERNEL_OK")
</pallas_src>

<mosaic_0001>
module attributes {stable_mosaic.version = 11 : i64} {
  func.func @_multi_output_kernel(%arg0: i32, %arg1: memref<8x512xf32, #tpu.memory_space<vmem>>, %arg2: memref<512x256xbf16, #tpu.memory_space<vmem>>, %arg3: memref<4x256xf32, #tpu.memory_space<vmem>>, %arg4: memref<256x128xbf16, #tpu.memory_space<vmem>>, %arg5: memref<8x128xf32, #tpu.memory_space<vmem>>) attributes {dimension_semantics = [#tpu.dimension_semantics<parallel>], iteration_bounds = array<i64: 1>, scalar_prefetch = 0 : i64, scratch_operands = 0 : i64, tpu.core_type = #tpu.core_type<tc>, window_params = [{transform_indices = @transform_0, window_bounds = array<i64: 8, 512>}, {pipeline_mode = #tpu.pipeline_mode<synchronous>, transform_indices = @transform_1, window_bounds = array<i64: 512, 256>}, {pipeline_mode = #tpu.pipeline_mode<synchronous>, transform_indices = @transform_2, window_bounds = array<i64: 4, 256>}, {pipeline_mode = #tpu.pipeline_mode<synchronous>, transform_indices = @transform_3, window_bounds = array<i64: 256, 128>}, {transform_indices = @transform_4, window_bounds = array<i64: 8, 128>}]} {
    %c0 = arith.constant 0 : index
    %c0_0 = arith.constant 0 : index
    %0 = vector.load %arg3[%c0, %c0_0] : memref<4x256xf32, #tpu.memory_space<vmem>>, vector<1x256xf32>
    %c1 = arith.constant 1 : index
    %c0_1 = arith.constant 0 : index
    %1 = vector.load %arg3[%c1, %c0_1] : memref<4x256xf32, #tpu.memory_space<vmem>>, vector<1x256xf32>
    %c2 = arith.constant 2 : index
    %c0_2 = arith.constant 0 : index
    %2 = vector.load %arg3[%c2, %c0_2] : memref<4x256xf32, #tpu.memory_space<vmem>>, vector<1x256xf32>
    %c3 = arith.constant 3 : index
    %c0_3 = arith.constant 0 : index
    %3 = vector.load %arg3[%c3, %c0_3] : memref<4x256xf32, #tpu.memory_space<vmem>>, vector<1x128xf32>
    %c0_4 = arith.constant 0 : index
    %c0_5 = arith.constant 0 : index
    %4 = vector.load %arg1[%c0_4, %c0_5] : memref<8x512xf32, #tpu.memory_space<vmem>>, vector<8x512xf32>
    %5 = arith.truncf %4 : vector<8x512xf32> to vector<8x512xbf16>
    %c0_6 = arith.constant 0 : index
    %c0_7 = arith.constant 0 : index
    %6 = vector.load %arg2[%c0_6, %c0_7] : memref<512x256xbf16, #tpu.memory_space<vmem>>, vector<512x256xbf16>
    %cst = arith.constant dense<0.000000e+00> : vector<8x256xf32>
    %7 = tpu.matmul %5, %6, %cst {dimension_numbers = #tpu.dot_dimension_numbers<[1], [0], [0], [1], [0, 0, 1, 1], [], []>} : vector<8x512xbf16>, vector<512x256xbf16>, vector<8x256xf32> -> vector<8x256xf32>
    %8 = vector.broadcast %0 : vector<1x256xf32> to vector<8x256xf32>
    %9 = arith.addf %7, %8 : vector<8x256xf32>
    %cst_8 = arith.constant 0.000000e+00 : f32
    %10 = vector.broadcast %cst_8 : f32 to vector<8x256xf32>
    %11 = arith.maximumf %9, %10 : vector<8x256xf32>
    %cst_9 = arith.constant dense<0.000000e+00> : vector<256xf32>
    %12 = vector.multi_reduction <add>, %11, %cst_9 [0] : vector<8x256xf32> to vector<256xf32>
    %13 = vector.shape_cast %12 : vector<256xf32> to vector<1x256xf32>
    %cst_10 = arith.constant 1.250000e-01 : f32
    %14 = vector.broadcast %cst_10 : f32 to vector<1x256xf32>
    %15 = arith.mulf %13, %14 : vector<1x256xf32>
    %16 = arith.mulf %11, %11 : vector<8x256xf32>
    %cst_11 = arith.constant dense<0.000000e+00> : vector<256xf32>
    %17 = vector.multi_reduction <add>, %16, %cst_11 [0] : vector<8x256xf32> to vector<256xf32>
    %18 = vector.shape_cast %17 : vector<256xf32> to vector<1x256xf32>
    %cst_12 = arith.constant 1.250000e-01 : f32
    %19 = vector.broadcast %cst_12 : f32 to vector<1x256xf32>
    %20 = arith.mulf %18, %19 : vector<1x256xf32>
    %21 = arith.mulf %15, %15 : vector<1x256xf32>
    %22 = arith.subf %20, %21 : vector<1x256xf32>
    %cst_13 = arith.constant 0.00999999977 : f32
    %23 = vector.broadcast %cst_13 : f32 to vector<1x256xf32>
    %24 = arith.addf %22, %23 : vector<1x256xf32>
    %25 = math.rsqrt %24 : vector<1x256xf32>
    %26 = arith.mulf %1, %25 : vector<1x256xf32>
    %27 = arith.mulf %15, %26 : vector<1x256xf32>
    %28 = arith.subf %2, %27 : vector<1x256xf32>
    %29 = vector.broadcast %26 : vector<1x256xf32> to vector<8x256xf32>
    %30 = arith.mulf %11, %29 : vector<8x256xf32>
    %31 = vector.broadcast %28 : vector<1x256xf32> to vector<8x256xf32>
    %32 = arith.addf %30, %31 : vector<8x256xf32>
    %33 = arith.truncf %32 : vector<8x256xf32> to vector<8x256xbf16>
    %c0_14 = arith.constant 0 : index
    %c0_15 = arith.constant 0 : index
    %34 = vector.load %arg4[%c0_14, %c0_15] : memref<256x128xbf16, #tpu.memory_space<vmem>>, vector<256x128xbf16>
    %cst_16 = arith.constant dense<0.000000e+00> : vector<8x128xf32>
    %35 = tpu.matmul %33, %34, %cst_16 {dimension_numbers = #tpu.dot_dimension_numbers<[1], [0], [0], [1], [0, 0, 1, 1], [], []>} : vector<8x256xbf16>, vector<256x128xbf16>, vector<8x128xf32> -> vector<8x128xf32>
    %36 = vector.broadcast %3 : vector<1x128xf32> to vector<8x128xf32>
    %37 = arith.addf %35, %36 : vector<8x128xf32>
    %38 = arith.negf %37 : vector<8x128xf32>
    %39 = math.exp %38 : vector<8x128xf32>
    %cst_17 = arith.constant 1.000000e+00 : f32
    %40 = vector.broadcast %cst_17 : f32 to vector<8x128xf32>
    %41 = arith.addf %40, %39 : vector<8x128xf32>
    %42 = arith.divf %40, %41 : vector<8x128xf32>
    %c0_18 = arith.constant 0 : index
    %c0_19 = arith.constant 0 : index
    %43 = vector.load %arg5[%c0_18, %c0_19] : memref<8x128xf32, #tpu.memory_space<vmem>>, vector<8x128xf32>
    tpu.vector_store %arg5[%c0_18, %c0_19], %42 {strides = array<i32>} : memref<8x128xf32, #tpu.memory_space<vmem>>, vector<8x128xf32>,
    return
  }
  func.func @transform_0(%arg0: i32) -> (i32, i32) {
    %c0_i32 = arith.constant 0 : i32
    %c0_i32_0 = arith.constant 0 : i32
    return %arg0, %c0_i32 : i32, i32
  }
  func.func @transform_1(%arg0: i32) -> (i32, i32) {
    %c0_i32 = arith.constant 0 : i32
    %c0_i32_0 = arith.constant 0 : i32
    %c0_i32_1 = arith.constant 0 : i32
    return %c0_i32, %c0_i32_0 : i32, i32
  }
  func.func @transform_2(%arg0: i32) -> (i32, i32) {
    %c0_i32 = arith.constant 0 : i32
    %c0_i32_0 = arith.constant 0 : i32
    %c0_i32_1 = arith.constant 0 : i32
    return %c0_i32, %c0_i32_0 : i32, i32
  }
  func.func @transform_3(%arg0: i32) -> (i32, i32) {
    %c0_i32 = arith.constant 0 : i32
    %c0_i32_0 = arith.constant 0 : i32
    %c0_i32_1 = arith.constant 0 : i32
    return %c0_i32, %c0_i32_0 : i32, i32
  }
  func.func @transform_4(%arg0: i32) -> (i32, i32) {
    %c0_i32 = arith.constant 0 : i32
    %c0_i32_0 = arith.constant 0 : i32
    return %arg0, %c0_i32 : i32, i32
  }
}

</mosaic_0001>

<bundles_post_ra>
// kernel: multi_output_forward.1
= control target key start
LH: loop header
LB: loop body
LE: loop exit
PB: predicated region body
PF: predicated region fallthrough
CT: control target
= control target key end

     0   :  { %9 = vsyncpa [#allocation3], 0  ;;  %s1457_s0 = inlined_call_operand.hbm [shape: f32[8,512], index: 0, kind: input, shape index: {}]   ;;  %s1458_s1 = inlined_call_operand.hbm [shape: bf16[512,256], index: 1, kind: input, shape index: {}]   ;;  %s1459_s2 = inlined_call_operand.hbm [shape: f32[4,256], index: 2, kind: input, shape index: {}]   ;;  %s1460_s3 = inlined_call_operand.hbm [shape: bf16[256,128], index: 3, kind: input, shape index: {}]   ;;  %s1461_s4 = inlined_call_operand.vmem [shape: f32[8,128], index: 4, kind: output, shape index: {}]  }
   0x1   :  { %10 = vsyncpa [#allocation5], 0  ;;  %s27_s17 = sshll.u32 %s1458_s1, 4  ;;  %s28_s17 = int_to_ptr.hbm [resolvable:$true] %s27_s17 }
   0x2   :  { %11 = vsyncpa [#allocation8], 0  ;;  %s1374_s18 = smov [#allocation4]   ;;  %s17_s22 = sshll.u32 %s1457_s0, 4  ;;  %s18_s22 = int_to_ptr.hbm [resolvable:$true] %s17_s22 }
   0x3   :  { %s29_s19 = sshll.u32 %s1374_s18, 4  ;;  %s1375_s23 = smov 128   ;;  %s30_s19 = int_to_ptr.vmem [resolvable:$true] %s29_s19 }
   0x4   :  { %s1376_s24 = smov 8   ;;  %s1377_s25 = smov [#allocation2]  }
   0x5   :  { %35 = dma.hbm_to_vmem [thread:$0]  %s28_s17, 8192, %s30_s19, [#allocation5], %s1375_s23, %s1375_s23, %s1376_s24  }
   0x6   :  { %s19_s26 = sshll.u32 %s1377_s25, 4  ;;  %s41_s29 = sshll.u32 %s1459_s2, 4  ;;  %s20_s26 = int_to_ptr.vmem [resolvable:$true] %s19_s26  ;;  %s42_s29 = int_to_ptr.hbm [resolvable:$true] %s41_s29 }
   0x7   :  { %22 = dma.hbm_to_vmem [thread:$0]  %s18_s22, 512, %s20_s26, [#allocation3]  }
   0x8   :  { %s51_s5 = sshll.u32 %s1460_s3, 4  ;;  %s1378_s6 = smov [#allocation6]   ;;  %s52_s5 = int_to_ptr.hbm [resolvable:$true] %s51_s5 }
   0x9   :  { %s43_s7 = sshll.u32 %s1378_s6, 4  ;;  %s1379_s0 = smov [#allocation7]   ;;  %s44_s7 = int_to_ptr.vmem [resolvable:$true] %s43_s7 }
   0xa   :  { %46 = dma.hbm_to_vmem [thread:$0]  %s42_s29, 128, %s44_s7, [#allocation5]  }
   0xb   :  { %s53_s8 = sshll.u32 %s1379_s0, 4  ;;  %s1380_s9 = smov 64   ;;  %s54_s8 = int_to_ptr.vmem [resolvable:$true] %s53_s8 }
   0xc   :  { %s1381_s10 = smov 4  }
   0xd   :  { %59 = dma.hbm_to_vmem [thread:$0]  %s52_s5, 2048, %s54_s8, [#allocation8], %s1380_s9, %s1380_s9, %s1381_s10  }
   0xe   :  { %1368 = dma.done.wait [#allocation3], 512  }
   0xf   :  { %1369 = vsyncadd [#allocation3], 4294966784 }
  0x10   :  { %1370 = dma.done.wait [#allocation5], 8320  }
  0x11   :  { %1371 = vsyncadd [#allocation5], 4294958976 }
  0x12   :  { %1372 = dma.done.wait [#allocation8], 2048  }
  0x13   :  { %1373 = vsyncadd [#allocation8], 4294965248  ;;  %v912_v0 = vld [vmem:[#allocation4 + $0x70] sm:$0xf]  ;;  %v1190_v1 = vld [vmem:[#allocation4 + $0x74] sm:$0xf0] }
  0x14   :  { %v976_v2 = vld [vmem:[#allocation4 + $0xf0] sm:$0xf]  ;;  %v913_v3 = vor.u32 %v1190_v1, %v912_v0  ;;  %v1206_v4 = vld [vmem:[#allocation4 + $0xf4] sm:$0xf0]  ;;  %v904_v11 = vld [vmem:[#allocation4 + $0x60] sm:$0xf] }
  0x15   :  { %v1040_v5 = vld [vmem:[#allocation4 + $0x170] sm:$0xf]  ;;  %v1222_v6 = vld [vmem:[#allocation4 + $0x174] sm:$0xf0]  ;;  %v977_v7 = vor.u32 %v1206_v4, %v976_v2  ;;  %v1188_v13 = vld [vmem:[#allocation4 + $0x64] sm:$0xf0] }
  0x16   :  { %v1041_v8 = vor.u32 %v1222_v6, %v1040_v5  ;;  %v1104_v9 = vld [vmem:[#allocation4 + $0x1f0] sm:$0xf]  ;;  %v1238_v10 = vld [vmem:[#allocation4 + $0x1f4] sm:$0xf0]  ;;  %479 = vmatpush.bf16.msra.mxu0 %v913_v3  ;;  %v968_v14 = vld [vmem:[#allocation4 + $0xe0] sm:$0xf]  ;;  %v905_v16 = vor.u32 %v1188_v13, %v904_v11 }
  0x17   :  { %v1105_v12 = vor.u32 %v1238_v10, %v1104_v9  ;;  %v1204_v15 = vld [vmem:[#allocation4 + $0xe4] sm:$0xf0]  ;;  %492 = vmatpush.bf16.msra.mxu1 %v977_v7  ;;  %v1032_v18 = vld [vmem:[#allocation4 + $0x160] sm:$0xf]  ;;  %v896_v23 = vld [vmem:[#allocation4 + $0x50] sm:$0xf] }
  0x18   :  { %505 = vmatpush.bf16.msra.mxu2 %v1041_v8  ;;  %v969_v17 = vor.u32 %v1204_v15, %v968_v14  ;;  %v1220_v19 = vld [vmem:[#allocation4 + $0x164] sm:$0xf0]  ;;  %v1096_v20 = vld [vmem:[#allocation4 + $0x1e0] sm:$0xf]  ;;  %v1186_v24 = vld [vmem:[#allocation4 + $0x54] sm:$0xf0] }
  0x19   :  { %518 = vmatpush.bf16.msra.mxu3 %v1105_v12  ;;  %v1033_v21 = vor.u32 %v1220_v19, %v1032_v18  ;;  %v1236_v22 = vld [vmem:[#allocation4 + $0x1e4] sm:$0xf0]  ;;  %v960_v26 = vld [vmem:[#allocation4 + $0xd0] sm:$0xf]  ;;  %v1202_v27 = vld [vmem:[#allocation4 + $0xd4] sm:$0xf0]  ;;  %v897_v29 = vor.u32 %v1186_v24, %v896_v23 }
  0x1a   :  { %v1097_v25 = vor.u32 %v1236_v22, %v1096_v20  ;;  %v1024_v28 = vld [vmem:[#allocation4 + $0x150] sm:$0xf]  ;;  %480 = vmatpush.bf16.msra.mxu0 %v905_v16  ;;  %v1218_v30 = vld [vmem:[#allocation4 + $0x154] sm:$0xf0]  ;;  %v961_v33 = vor.u32 %v1202_v27, %v960_v26  ;;  %v888_v35 = vld [vmem:[#allocation4 + $0x40] sm:$0xf] }
  0x1b   :  { %v1088_v31 = vld [vmem:[#allocation4 + $0x1d0] sm:$0xf]  ;;  %v1234_v32 = vld [vmem:[#allocation4 + $0x1d4] sm:$0xf0]  ;;  %493 = vmatpush.bf16.msra.mxu1 %v969_v17  ;;  %v1025_v34 = vor.u32 %v1218_v30, %v1024_v28  ;;  %v1184_v36 = vld [vmem:[#allocation4 + $0x44] sm:$0xf0] }
  0x1c   :  { %506 = vmatpush.bf16.msra.mxu2 %v1033_v21  ;;  %v952_v37 = vld [vmem:[#allocation4 + $0xc0] sm:$0xf]  ;;  %v1089_v38 = vor.u32 %v1234_v32, %v1088_v31  ;;  %v1200_v39 = vld [vmem:[#allocation4 + $0xc4] sm:$0xf0]  ;;  %v889_v44 = vor.u32 %v1184_v36, %v888_v35  ;;  %v880_v47 = vld [vmem:[#allocation4 + $0x30] sm:$0xf] }
  0x1d   :  { %519 = vmatpush.bf16.msra.mxu3 %v1097_v25  ;;  %v1016_v40 = vld [vmem:[#allocation4 + $0x140] sm:$0xf]  ;;  %v1216_v41 = vld [vmem:[#allocation4 + $0x144] sm:$0xf0]  ;;  %v953_v45 = vor.u32 %v1200_v39, %v952_v37  ;;  %v1182_v48 = vld [vmem:[#allocation4 + $0x34] sm:$0xf0] }
  0x1e   :  { %v1080_v42 = vld [vmem:[#allocation4 + $0x1c0] sm:$0xf]  ;;  %v1232_v43 = vld [vmem:[#allocation4 + $0x1c4] sm:$0xf0]  ;;  %481 = vmatpush.bf16.msra.mxu0 %v897_v29  ;;  %v1017_v46 = vor.u32 %v1216_v41, %v1016_v40  ;;  %v944_v49 = vld [vmem:[#allocation4 + $0xb0] sm:$0xf]  ;;  %v881_v56 = vor.u32 %v1182_v48, %v880_v47 }
  0x1f   :  { %494 = vmatpush.bf16.msra.mxu1 %v961_v33  ;;  %v1081_v50 = vor.u32 %v1232_v43, %v1080_v42  ;;  %v1198_v51 = vld [vmem:[#allocation4 + $0xb4] sm:$0xf0]  ;;  %v1008_v52 = vld [vmem:[#allocation4 + $0x130] sm:$0xf]  ;;  %v872_v59 = vld [vmem:[#allocation4 + $0x20] sm:$0xf] }
  0x20   :  { %507 = vmatpush.bf16.msra.mxu2 %v1025_v34  ;;  %v1214_v53 = vld [vmem:[#allocation4 + $0x134] sm:$0xf0]  ;;  %v1072_v54 = vld [vmem:[#allocation4 + $0x1b0] sm:$0xf]  ;;  %v945_v57 = vor.u32 %v1198_v51, %v944_v49  ;;  %v1180_v60 = vld [vmem:[#allocation4 + $0x24] sm:$0xf0] }
  0x21   :  { %520 = vmatpush.bf16.msra.mxu3 %v1089_v38  ;;  %v1230_v55 = vld [vmem:[#allocation4 + $0x1b4] sm:$0xf0]  ;;  %v1009_v58 = vor.u32 %v1214_v53, %v1008_v52  ;;  %v936_v61 = vld [vmem:[#allocation4 + $0xa0] sm:$0xf]  ;;  %v1196_v63 = vld [vmem:[#allocation4 + $0xa4] sm:$0xf0]  ;;  %v873_v4 = vor.u32 %v1180_v60, %v872_v59 }
  0x22   :  { %482 = vmatpush.bf16.msra.mxu0 %v889_v44  ;;  %v1073_v62 = vor.u32 %v1230_v55, %v1072_v54  ;;  %v1000_v0 = vld [vmem:[#allocation4 + $0x120] sm:$0xf]  ;;  %v1212_v1 = vld [vmem:[#allocation4 + $0x124] sm:$0xf0]  ;;  %v937_v5 = vor.u32 %v1196_v63, %v936_v61  ;;  %v864_v7 = vld [vmem:[#allocation4 + $0x10] sm:$0xf] }
  0x23   :  { %495 = vmatpush.bf16.msra.mxu1 %v953_v45  ;;  %v1064_v2 = vld [vmem:[#allocation4 + $0x1a0] sm:$0xf]  ;;  %v1228_v3 = vld [vmem:[#allocation4 + $0x1a4] sm:$0xf0]  ;;  %v1001_v6 = vor.u32 %v1212_v1, %v1000_v0  ;;  %v1178_v8 = vld [vmem:[#allocation4 + $0x14] sm:$0xf0] }
  0x24   :  { %508 = vmatpush.bf16.msra.mxu2 %v1017_v46  ;;  %v928_v9 = vld [vmem:[#allocation4 + $0x90] sm:$0xf]  ;;  %v1065_v10 = vor.u32 %v1228_v3, %v1064_v2  ;;  %v1194_v11 = vld [vmem:[#allocation4 + $0x94] sm:$0xf0]  ;;  %v865_v16 = vor.u32 %v1178_v8, %v864_v7  ;;  %v856_v17 = vld [vmem:[#allocation4] sm:$0xf] }
  0x25   :  { %521 = vmatpush.bf16.msra.mxu3 %v1081_v50  ;;  %v992_v12 = vld [vmem:[#allocation4 + $0x110] sm:$0xf]  ;;  %v1210_v13 = vld [vmem:[#allocation4 + $0x114] sm:$0xf0]  ;;  %v1176_v18 = vld [vmem:[#allocation4 + $0x4] sm:$0xf0]  ;;  %v929_v19 = vor.u32 %v1194_v11, %v928_v9 }
  0x26   :  { %483 = vmatpush.bf16.msra.mxu0 %v881_v56  ;;  %v1056_v14 = vld [vmem:[#allocation4 + $0x190] sm:$0xf]  ;;  %v1226_v15 = vld [vmem:[#allocation4 + $0x194] sm:$0xf0]  ;;  %v993_v20 = vor.u32 %v1210_v13, %v992_v12  ;;  %v920_v21 = vld [vmem:[#allocation4 + $0x80] sm:$0xf]  ;;  %v857_v31 = vor.u32 %v1176_v18, %v856_v17 }
  0x27   :  { %496 = vmatpush.bf16.msra.mxu1 %v945_v57  ;;  %v1192_v22 = vld [vmem:[#allocation4 + $0x84] sm:$0xf0]  ;;  %v984_v23 = vld [vmem:[#allocation4 + $0x100] sm:$0xf]  ;;  %v1057_v24 = vor.u32 %v1226_v15, %v1056_v14  ;;  %v1189_v28 = vld [vmem:[#allocation4 + $0x74] sm:$0xf] }
  0x28   :  { %509 = vmatpush.bf16.msra.mxu2 %v1009_v58  ;;  %v1208_v25 = vld [vmem:[#allocation4 + $0x104] sm:$0xf0]  ;;  %v1048_v26 = vld [vmem:[#allocation4 + $0x180] sm:$0xf]  ;;  %v914_v29 = vld [vmem:[#allocation4 + $0x78] sm:$0xf0]  ;;  %v921_v35 = vor.u32 %v1192_v22, %v920_v21 }
  0x29   :  { %522 = vmatpush.bf16.msra.mxu3 %v1073_v62  ;;  %v1224_v27 = vld [vmem:[#allocation4 + $0x184] sm:$0xf0]  ;;  %v1205_v30 = vld [vmem:[#allocation4 + $0xf4] sm:$0xf]  ;;  %v978_v32 = vld [vmem:[#allocation4 + $0xf8] sm:$0xf0]  ;;  %v985_v36 = vor.u32 %v1208_v25, %v984_v23  ;;  %v917_v41 = vor.u32 %v1189_v28, %v914_v29 }
  0x2a   :  { %484 = vmatpush.bf16.msra.mxu0 %v873_v4  ;;  %v1221_v33 = vld [vmem:[#allocation4 + $0x174] sm:$0xf]  ;;  %v1042_v34 = vld [vmem:[#allocation4 + $0x178] sm:$0xf0]  ;;  %v1049_v40 = vor.u32 %v1224_v27, %v1048_v26  ;;  %v82_v42 = vld [vmem:[#allocation2] sm:$0xff]  ;;  %v981_v45 = vor.u32 %v1205_v30, %v978_v32  ;;  %vm644_vm5 = vcmask 1040384  }
  0x2b   :  { %497 = vmatpush.bf16.msra.mxu1 %v937_v5  ;;  %v1237_v37 = vld [vmem:[#allocation4 + $0x1f4] sm:$0xf]  ;;  %v1106_v38 = vld [vmem:[#allocation4 + $0x1f8] sm:$0xf0]  ;;  %v1187_v44 = vld [vmem:[#allocation4 + $0x64] sm:$0xf]  ;;  %v1045_v46 = vor.u32 %v1221_v33, %v1042_v34  ;;  %v1421_v55 = vpack.c.bf16 %v82_v42, %v82_v42 }
  0x2c   :  { %510 = vmatpush.bf16.msra.mxu2 %v1001_v6  ;;  %v84_v39 = vld [vmem:[#allocation2 + $0x10] sm:$0xff]  ;;  %v85_v43 = vld [vmem:[#allocation2 + $0x18] sm:$0xff]  ;;  %v906_v47 = vld [vmem:[#allocation4 + $0x68] sm:$0xf0]  ;;  %v1109_v50 = vor.u32 %v1237_v37, %v1106_v38 }
  0x2d   :  { %523 = vmatpush.bf16.msra.mxu3 %v1065_v10  ;;  %v1203_v48 = vld [vmem:[#allocation4 + $0xe4] sm:$0xf]  ;;  %v83_v49 = vld [vmem:[#allocation2 + $0x8] sm:$0xff]  ;;  %v1419_v51 = vpack.c.bf16 %v84_v39, %v84_v39  ;;  %v1423_v56 = vpack.c.bf16 %v85_v43, %v85_v43  ;;  %v909_v59 = vor.u32 %v1187_v44, %v906_v47  ;;  %v1185_v63 = vld [vmem:[#allocation4 + $0x54] sm:$0xf] }
  0x2e   :  { %485 = vmatpush.bf16.msra.mxu0 %v865_v16  ;;  %v970_v52 = vld [vmem:[#allocation4 + $0xe8] sm:$0xf0]  ;;  %v1219_v53 = vld [vmem:[#allocation4 + $0x164] sm:$0xf]  ;;  %v1425_v60 = vpack.c.bf16 %v83_v49, %v83_v49  ;;  %v898_v0 = vld [vmem:[#allocation4 + $0x58] sm:$0xf0] }
  0x2f   :  { %498 = vmatpush.bf16.msra.mxu1 %v929_v19  ;;  %v1034_v54 = vld [vmem:[#allocation4 + $0x168] sm:$0xf0]  ;;  %v1235_v57 = vld [vmem:[#allocation4 + $0x1e4] sm:$0xf]  ;;  %v973_v61 = vor.u32 %v1203_v48, %v970_v52  ;;  %v1201_v1 = vld [vmem:[#allocation4 + $0xd4] sm:$0xf]  ;;  %v901_v8 = vor.u32 %v1185_v63, %v898_v0 }
  0x30   :  { %511 = vmatpush.bf16.msra.mxu2 %v993_v20  ;;  %v1098_v58 = vld [vmem:[#allocation4 + $0x1e8] sm:$0xf0]  ;;  %v1037_v62 = vor.u32 %v1219_v53, %v1034_v54  ;;  %v962_v3 = vld [vmem:[#allocation4 + $0xd8] sm:$0xf0]  ;;  %v1217_v4 = vld [vmem:[#allocation4 + $0x154] sm:$0xf] }
  0x31   :  { %524 = vmatpush.bf16.msra.mxu3 %v1057_v24  ;;  %v1101_v2 = vor.u32 %v1235_v57, %v1098_v58  ;;  %v1026_v5 = vld [vmem:[#allocation4 + $0x158] sm:$0xf0]  ;;  %v1233_v6 = vld [vmem:[#allocation4 + $0x1d4] sm:$0xf]  ;;  %v965_v9 = vor.u32 %v1201_v1, %v962_v3  ;;  %v1183_v11 = vld [vmem:[#allocation4 + $0x44] sm:$0xf] }
  0x32   :  { %486 = vmatpush.bf16.msra.mxu0 %v857_v31  ;;  %v1090_v7 = vld [vmem:[#allocation4 + $0x1d8] sm:$0xf0]  ;;  %v1029_v10 = vor.u32 %v1217_v4, %v1026_v5  ;;  %v890_v12 = vld [vmem:[#allocation4 + $0x48] sm:$0xf0]  ;;  %v1199_v13 = vld [vmem:[#allocation4 + $0xc4] sm:$0xf] }
  0x33   :  { %499 = vmatpush.bf16.msra.mxu1 %v921_v35  ;;  %v1093_v14 = vor.u32 %v1233_v6, %v1090_v7  ;;  %v954_v15 = vld [vmem:[#allocation4 + $0xc8] sm:$0xf0]  ;;  %v1215_v16 = vld [vmem:[#allocation4 + $0x144] sm:$0xf]  ;;  %v893_v20 = vor.u32 %v1183_v11, %v890_v12  ;;  %v1181_v23 = vld [vmem:[#allocation4 + $0x34] sm:$0xf] }
  0x34   :  { %512 = vmatpush.bf16.msra.mxu2 %v985_v36  ;;  %v1018_v17 = vld [vmem:[#allocation4 + $0x148] sm:$0xf0]  ;;  %v1231_v18 = vld [vmem:[#allocation4 + $0x1c4] sm:$0xf]  ;;  %v957_v21 = vor.u32 %v1199_v13, %v954_v15  ;;  %v882_v24 = vld [vmem:[#allocation4 + $0x38] sm:$0xf0] }
  0x35   :  { %525 = vmatpush.bf16.msra.mxu3 %v1049_v40  ;;  %487 = vmatmul.bf16.vlgmr.msra.gmra.mxu0 %v1421_v55  ;;  %v1082_v19 = vld [vmem:[#allocation4 + $0x1c8] sm:$0xf0]  ;;  %v1021_v22 = vor.u32 %v1215_v16, %v1018_v17  ;;  %v1197_v25 = vld [vmem:[#allocation4 + $0xb4] sm:$0xf]  ;;  %v946_v27 = vld [vmem:[#allocation4 + $0xb8] sm:$0xf0]  ;;  %v885_v32 = vor.u32 %v1181_v23, %v882_v24 }
  0x36   :  { %531 = vmatpush.bf16.msrb.mxu0 %v917_v41  ;;  %500 = vmatmul.bf16.vlgmr.msra.gmra.mxu1 %v1425_v60  ;;  %v1085_v26 = vor.u32 %v1231_v18, %v1082_v19  ;;  %v1213_v28 = vld [vmem:[#allocation4 + $0x134] sm:$0xf]  ;;  %v1010_v29 = vld [vmem:[#allocation4 + $0x138] sm:$0xf0]  ;;  %v949_v33 = vor.u32 %v1197_v25, %v946_v27  ;;  %v1179_v35 = vld [vmem:[#allocation4 + $0x24] sm:$0xf] }
  0x37   :  { %544 = vmatpush.bf16.msrb.mxu1 %v981_v45  ;;  %513 = vmatmul.bf16.vlgmr.msra.gmra.mxu2 %v1419_v51  ;;  %v1229_v30 = vld [vmem:[#allocation4 + $0x1b4] sm:$0xf]  ;;  %v1074_v31 = vld [vmem:[#allocation4 + $0x1b8] sm:$0xf0]  ;;  %v1013_v34 = vor.u32 %v1213_v28, %v1010_v29  ;;  %v874_v36 = vld [vmem:[#allocation4 + $0x28] sm:$0xf0] }
  0x38   :  { %557 = vmatpush.bf16.msrb.mxu2 %v1045_v46  ;;  %526 = vmatmul.bf16.vlgmr.msra.gmra.mxu3 %v1423_v56  ;;  %v1195_v37 = vld [vmem:[#allocation4 + $0xa4] sm:$0xf]  ;;  %v1077_v38 = vor.u32 %v1229_v30, %v1074_v31  ;;  %v938_v39 = vld [vmem:[#allocation4 + $0xa8] sm:$0xf0]  ;;  %v877_v44 = vor.u32 %v1179_v35, %v874_v36  ;;  %v1177_v47 = vld [vmem:[#allocation4 + $0x14] sm:$0xf] }
  0x39   :  { %570 = vmatpush.bf16.msrb.mxu3 %v1109_v50  ;;  %v1211_v40 = vld [vmem:[#allocation4 + $0x124] sm:$0xf]  ;;  %v1002_v41 = vld [vmem:[#allocation4 + $0x128] sm:$0xf0]  ;;  %v941_v45 = vor.u32 %v1195_v37, %v938_v39  ;;  %v866_v48 = vld [vmem:[#allocation4 + $0x18] sm:$0xf0] }
  0x3a   :  { %532 = vmatpush.bf16.msrb.mxu0 %v909_v59  ;;  %v1227_v42 = vld [vmem:[#allocation4 + $0x1a4] sm:$0xf]  ;;  %v1066_v43 = vld [vmem:[#allocation4 + $0x1a8] sm:$0xf0]  ;;  %v1005_v46 = vor.u32 %v1211_v40, %v1002_v41  ;;  %v1193_v49 = vld [vmem:[#allocation4 + $0x94] sm:$0xf]  ;;  %v869_v59 = vor.u32 %v1177_v47, %v866_v48 }
  0x3b   :  { %545 = vmatpush.bf16.msrb.mxu1 %v973_v61  ;;  %v1069_v50 = vor.u32 %v1227_v42, %v1066_v43  ;;  %v930_v52 = vld [vmem:[#allocation4 + $0x98] sm:$0xf0]  ;;  %v1209_v53 = vld [vmem:[#allocation4 + $0x114] sm:$0xf]  ;;  %v1175_v63 = vld [vmem:[#allocation4 + $0x4] sm:$0xf] }
  0x3c   :  { %558 = vmatpush.bf16.msrb.mxu2 %v1037_v62  ;;  %v994_v54 = vld [vmem:[#allocation4 + $0x118] sm:$0xf0]  ;;  %v1225_v57 = vld [vmem:[#allocation4 + $0x194] sm:$0xf]  ;;  %v933_v61 = vor.u32 %v1193_v49, %v930_v52  ;;  %v858_v0 = vld [vmem:[#allocation4 + $0x8] sm:$0xf0] }
  0x3d   :  { %571 = vmatpush.bf16.msrb.mxu3 %v1101_v2  ;;  %v1058_v58 = vld [vmem:[#allocation4 + $0x198] sm:$0xf0]  ;;  %v997_v62 = vor.u32 %v1209_v53, %v994_v54  ;;  %v1191_v1 = vld [vmem:[#allocation4 + $0x84] sm:$0xf]  ;;  %v922_v3 = vld [vmem:[#allocation4 + $0x88] sm:$0xf0] }
  0x3e   :  { %533 = vmatpush.bf16.msrb.mxu0 %v901_v8  ;;  %v1061_v2 = vor.u32 %v1225_v57, %v1058_v58  ;;  %v1207_v4 = vld [vmem:[#allocation4 + $0x104] sm:$0xf]  ;;  %v986_v5 = vld [vmem:[#allocation4 + $0x108] sm:$0xf0]  ;;  %v861_v8 = vor.u32 %v1175_v63, %v858_v0  ;;  %v1245_v54 = vld [vmem:[#allocation7 + $0x30] sm:$0xff] }
  0x3f   :  { %546 = vmatpush.bf16.msrb.mxu1 %v965_v9  ;;  %v1223_v6 = vld [vmem:[#allocation4 + $0x184] sm:$0xf]  ;;  %v1050_v7 = vld [vmem:[#allocation4 + $0x188] sm:$0xf0]  ;;  %v925_v9 = vor.u32 %v1191_v1, %v922_v3  ;;  %v1253_v57 = vld [vmem:[#allocation7 + $0x70] sm:$0xff] }
  0x40   :  { %559 = vmatpush.bf16.msrb.mxu2 %v1029_v10  ;;  %v989_v10 = vor.u32 %v1207_v4, %v986_v5  ;;  %v1053_v11 = vor.u32 %v1223_v6, %v1050_v7  ;;  %v76_v12 = vld [vmem:[#allocation6] ss:$4 sm:$0x3]  ;;  %v1252_v3 = vld [vmem:[#allocation7 + $0x68] sm:$0xff] }
  0x41   :  { %572 = vmatpush.bf16.msrb.mxu3 %v1093_v14  ;;  %v155_v13 = vperm.slane %v76_v12, 0  ;;  %v156_v31 = vperm.slane %v76_v12, 1  ;;  %v1254_v47 = vld [vmem:[#allocation7 + $0x78] sm:$0xff] }
  0x42   :  { %534 = vmatpush.bf16.msrb.mxu0 %v893_v20 }
  0x43   :  { %547 = vmatpush.bf16.msrb.mxu1 %v957_v21 }
  0x44   :  { %560 = vmatpush.bf16.msrb.mxu2 %v1021_v22 }
  0x45   :  { %573 = vmatpush.bf16.msrb.mxu3 %v1085_v26 }
  0x46   :  { %535 = vmatpush.bf16.msrb.mxu0 %v885_v32 }
  0x47   :  { %548 = vmatpush.bf16.msrb.mxu1 %v949_v33 }
  0x48   :  { %561 = vmatpush.bf16.msrb.mxu2 %v1013_v34 }
  0x49   :  { %574 = vmatpush.bf16.msrb.mxu3 %v1077_v38 }
  0x4a   :  { %536 = vmatpush.bf16.msrb.mxu0 %v877_v44 }
  0x4b   :  { %549 = vmatpush.bf16.msrb.mxu1 %v941_v45 }
  0x4c   :  { %562 = vmatpush.bf16.msrb.mxu2 %v1005_v46  ;;  %v1246_v46 = vld [vmem:[#allocation7 + $0x38] sm:$0xff] }
  0x4d   :  { %575 = vmatpush.bf16.msrb.mxu3 %v1069_v50 }
  0x4e   :  { %537 = vmatpush.bf16.msrb.mxu0 %v869_v59 }
  0x4f   :  { %550 = vmatpush.bf16.msrb.mxu1 %v933_v61 }
  0x50   :  { %563 = vmatpush.bf16.msrb.mxu2 %v997_v62 }
  0x51   :  { %576 = vmatpush.bf16.msrb.mxu3 %v1061_v2  ;;  %v1244_v2 = vld [vmem:[#allocation7 + $0x28] sm:$0xff] }
  0x52   :  { %538 = vmatpush.bf16.msrb.mxu0 %v861_v8 }
  0x53   :  { %551 = vmatpush.bf16.msrb.mxu1 %v925_v9  ;;  %v1243_v9 = vld [vmem:[#allocation7 + $0x20] sm:$0xff] }
  0x54   :  { %564 = vmatpush.bf16.msrb.mxu2 %v989_v10  ;;  %v1251_v10 = vld [vmem:[#allocation7 + $0x60] sm:$0xff] }
  0x55   :  { %577 = vmatpush.bf16.msrb.mxu3 %v1053_v11  ;;  %539 = vmatmul.bf16.vlgmr.msrb.gmra.mxu0 %v1421_v55 }
  0x56   :  { %552 = vmatmul.bf16.vlgmr.msrb.gmra.mxu1 %v1425_v60  ;;  %801 = vmatpush.bf16.msra.mxu0 %v1246_v46 }
  0x57   :  { %565 = vmatmul.bf16.vlgmr.msrb.gmra.mxu2 %v1419_v51  ;;  %814 = vmatpush.bf16.msra.mxu1 %v1254_v47 }
  0x58   :  { %578 = vmatmul.bf16.vlgmr.msrb.gmra.mxu3 %v1423_v56 }
  0x5a   :  { %802 = vmatpush.bf16.msra.mxu0 %v1245_v54 }
  0x5b   :  { %815 = vmatpush.bf16.msra.mxu1 %v1253_v57 }
  0x5e   :  { %803 = vmatpush.bf16.msra.mxu0 %v1244_v2  ;;  %v1263_v2 = vld [vmem:[#allocation6 + $0x3] ss:$0 sm:$0xff] }
  0x5f   :  { %816 = vmatpush.bf16.msra.mxu1 %v1252_v3 }
  0x62   :  { %804 = vmatpush.bf16.msra.mxu0 %v1243_v9 }
  0x63   :  { %817 = vmatpush.bf16.msra.mxu1 %v1251_v10 }
  0xb2   :  { %v488_v14 = vpop.f32.mrf.mxu0 }
  0xb3   :  { %v489_v15 = vadd.f32 %v488_v14, %v155_v13  ;;  %v501_v16 = vpop.f32.mrf.mxu1 }
  0xb5   :  { %v502_v17 = vadd.f32 %v501_v16, %v489_v15  ;;  %v1242_v15 = vld [vmem:[#allocation7 + $0x18] sm:$0xff] }
  0xb6   :  { %v1250_v16 = vld [vmem:[#allocation7 + $0x58] sm:$0xff]  ;;  %805 = vmatpush.bf16.msra.mxu0 %v1242_v15 }
  0xb7   :  { %818 = vmatpush.bf16.msra.mxu1 %v1250_v16 }
  0xba   :  { %v514_v18 = vpop.f32.mrf.mxu2  ;;  %v490_v22 = vpop.f32.mrf.mxu0 }
  0xbb   :  { %v515_v19 = vadd.f32 %v514_v18, %v502_v17  ;;  %v527_v20 = vpop.f32.mrf.mxu3  ;;  %v503_v23 = vpop.f32.mrf.mxu1  ;;  %v1249_v22 = vld [vmem:[#allocation7 + $0x50] sm:$0xff] }
  0xbc   :  { %819 = vmatpush.bf16.msra.mxu1 %v1249_v22 }
  0xbd   :  { %v528_v21 = vadd.f32 %v527_v20, %v515_v19 }
  0xbf   :  { %v1435_v24 = vmax.f32 %v528_v21, 0.0  ;;  %v1241_v21 = vld [vmem:[#allocation7 + $0x10] sm:$0xff] }
  0xc0   :  { %806 = vmatpush.bf16.msra.mxu0 %v1241_v21 }
  0xc1   :  { %v585_v55 = vrot.slane %v1435_v24, 4  ;;  %v599_v51 = vmul.f32 %v1435_v24, %v1435_v24 }
  0xc2   :  { %v516_v56 = vpop.f32.mrf.mxu2 }
  0xc3   :  { %v529_v60 = vpop.f32.mrf.mxu3  ;;  %v586_v25 = vadd.f32 %v585_v55, %v1435_v24  ;;  %v601_v26 = vrot.slane %v599_v51, 4  ;;  %v1248_v56 = vld [vmem:[#allocation7 + $0x48] sm:$0xff] }
  0xc4   :  { %820 = vmatpush.bf16.msra.mxu1 %v1248_v56 }
  0xc5   :  { %v587_v27 = vrot.slane %v586_v25, 2  ;;  %v602_v28 = vadd.f32 %v601_v26, %v599_v51  ;;  %v1240_v51 = vld [vmem:[#allocation7 + $0x8] sm:$0xff]  ;;  %v1239_v26 = vld [vmem:[#allocation7] sm:$0xff] }
  0xc6   :  { %807 = vmatpush.bf16.msra.mxu0 %v1240_v51 }
  0xc7   :  { %v588_v29 = vadd.f32 %v587_v27, %v586_v25  ;;  %v603_v30 = vrot.slane %v602_v28, 2  ;;  %v1247_v27 = vld [vmem:[#allocation7 + $0x40] sm:$0xff] }
  0xc8   :  { %821 = vmatpush.bf16.msra.mxu1 %v1247_v27 }
  0xc9   :  { %v589_v32 = vrot.slane %v588_v29, 1  ;;  %v604_v33 = vadd.f32 %v603_v30, %v602_v28 }
  0xca   :  { %808 = vmatpush.bf16.msra.mxu0 %v1239_v26 }
  0xcb   :  { %v590_v37 = vadd.f32 %v589_v32, %v588_v29  ;;  %v605_v38 = vrot.slane %v604_v33, 1 }
  0xcd   :  { %v1441_v41 = vmul.f32 0.125, %v590_v37  ;;  %v606_v42 = vadd.f32 %v605_v38, %v604_v33 }
  0xcf   :  { %v613_v50 = vmul.f32 0.125, %v606_v42  ;;  %v615_v52 = vmul.f32 %v1441_v41, %v1441_v41 }
  0xd1   :  { %v617_v62 = vsub.f32 %v613_v50, %v615_v52 }
  0xd2   :  { %v540_v34 = vpop.f32.mrf.mxu0 }
  0xd3   :  { %v541_v35 = vadd.f32 %v540_v34, %v156_v31  ;;  %v553_v36 = vpop.f32.mrf.mxu1  ;;  %v619_v6 = vadd.f32 0.01, %v617_v62 }
  0xd5   :  { %v554_v39 = vadd.f32 %v553_v36, %v541_v35  ;;  %1264 = vrsqrt.f32 %v619_v6  ;;  %vm627_vm1 = vweird.f32 %v619_v6 }
  0xda   :  { %v566_v40 = vpop.f32.mrf.mxu2  ;;  %v542_v45 = vpop.f32.mrf.mxu0 }
  0xdb   :  { %v567_v43 = vadd.f32 %v566_v40, %v554_v39  ;;  %v579_v44 = vpop.f32.mrf.mxu3  ;;  %v555_v48 = vpop.f32.mrf.mxu1  ;;  %v78_v39 = vld [vmem:[#allocation6 + $0x1] ss:$4 sm:$0x3] }
  0xdc   :  { %v1265_v23 = vpop.eup %1264 }
  0xdd   :  { %v580_v49 = vadd.f32 %v579_v44, %v567_v43  ;;  %v622_v25 = vmul.f32 %v1265_v23, %v619_v6  ;;  %vm628_vm2 = vweird.f32 %v1265_v23 }
  0xde   :  { %vm629_vm6 = vmor %vm627_vm1, %vm628_vm2 }
  0xdf   :  { %v1445_v53 = vmax.f32 %v580_v49, 0.0  ;;  %v623_v28 = vmul.f32 %v1265_v23, %v622_v25  ;;  %v80_v49 = vld [vmem:[#allocation6 + $0x2] ss:$4 sm:$0x3] }
  0xe1   :  { %v591_v58 = vrot.slane %v1445_v53, 4  ;;  %v600_v59 = vmul.f32 %v1445_v53, %v1445_v53  ;;  %v624_v30 = vmul.f32 0.5, %v623_v28 }
  0xe2   :  { %v568_v61 = vpop.f32.mrf.mxu2 }
  0xe3   :  { %v592_v63 = vadd.f32 %v591_v58, %v1445_v53  ;;  %v607_v0 = vrot.slane %v600_v59, 4  ;;  %v581_v1 = vpop.f32.mrf.mxu3  ;;  %v625_v33 = vsub.f32 1.5, %v624_v30 }
  0xe5   :  { %v593_v4 = vrot.slane %v592_v63, 2  ;;  %v608_v5 = vadd.f32 %v607_v0, %v600_v59  ;;  %v626_v36 = vmul.f32 %v1265_v23, %v625_v33 }
  0xe7   :  { %v594_v7 = vadd.f32 %v593_v4, %v592_v63  ;;  %v609_v8 = vrot.slane %v608_v5, 2  ;;  %v630_v42 = vsel %vm629_vm6, %v1265_v23, %v626_v36 }
  0xe9   :  { %v595_v11 = vrot.slane %v594_v7, 1  ;;  %v610_v12 = vadd.f32 %v609_v8, %v608_v5 }
  0xeb   :  { %v596_v13 = vadd.f32 %v595_v11, %v594_v7  ;;  %v611_v14 = vrot.slane %v610_v12, 1 }
  0xed   :  { %v598_v17 = vmul.f32 0.125, %v596_v13  ;;  %v612_v18 = vadd.f32 %v611_v14, %v610_v12 }
  0xef   :  { %v614_v19 = vmul.f32 0.125, %v612_v18  ;;  %v616_v20 = vmul.f32 %v598_v17, %v598_v17 }
  0xf1   :  { %v618_v55 = vsub.f32 %v614_v19, %v616_v20 }
  0xf3   :  { %v620_v60 = vadd.f32 0.01, %v618_v55 }
  0xf5   :  { %1266 = vrsqrt.f32 %v620_v60  ;;  %vm637_vm3 = vweird.f32 %v620_v60 }
  0xfb   :  { %v1267_v29 = vpop.eup %1266 }
  0xfc   :  { %v632_v31 = vmul.f32 %v1267_v29, %v620_v60  ;;  %vm638_vm0 = vweird.f32 %v1267_v29 }
  0xfd   :  { %vm639_vm4 = vmor %vm637_vm3, %vm638_vm0 }
  0xfe   :  { %v633_v32 = vmul.f32 %v1267_v29, %v632_v31 }
 0x100   :  { %v634_v34 = vmul.f32 0.5, %v633_v32 }
 0x102   :  { %v635_v35 = vsub.f32 1.5, %v634_v34 }
 0x104   :  { %v636_v37 = vmul.f32 %v1267_v29, %v635_v35 }
 0x106   :  { %v640_v38 = vsel %vm639_vm4, %v1267_v29, %v636_v37 }
 0x107   :  { %v643_v40 = vrot.slane %v640_v38, 7 }
 0x109   :  { %v645_v43 = vsel %vm644_vm5, %v630_v42, %v643_v40 }
 0x10a   :  { %v647_v44 = vmul.f32 %v645_v43, %v78_v39 }
 0x10c   :  { %v650_v45 = vperm.slane %v647_v44, 1  ;;  %v649_v46 = vperm.slane %v647_v44, 0 }
 0x10e   :  { %v654_v47 = vmul.f32 %v650_v45, %v598_v17  ;;  %v653_v50 = vmul.f32 %v649_v46, %v1441_v41  ;;  %v662_v57 = vmul.f32 %v650_v45, %v1445_v53  ;;  %v661_v58 = vmul.f32 %v649_v46, %v1435_v24 }
 0x110   :  { %v657_v48 = vrot.slane %v654_v47, 7 }
 0x112   :  { %v658_v52 = vsel %vm644_vm5, %v653_v50, %v657_v48 }
 0x113   :  { %v660_v54 = vsub.f32 %v80_v49, %v658_v52 }
 0x115   :  { %v664_v59 = vperm.slane %v660_v54, 0  ;;  %v665_v61 = vperm.slane %v660_v54, 1 }
 0x117   :  { %v668_v62 = vadd.f32 %v664_v59, %v661_v58  ;;  %v669_v63 = vadd.f32 %v665_v61, %v662_v57 }
 0x119   :  { %v670_v0 = vpack.c.bf16 %v668_v62, %v668_v62  ;;  %v671_v1 = vpack.c.bf16 %v669_v63, %v669_v63 }
 0x11b   :  { %809 = vmatmul.bf16.vlgmr.msra.gmra.mxu0 %v670_v0  ;;  %822 = vmatmul.bf16.vlgmr.msra.gmra.mxu1 %v671_v1 }
 0x198   :  { %v810_v3 = vpop.f32.mrf.mxu0  ;;  %v823_v4 = vpop.f32.mrf.mxu1 }
 0x199   :  { %v811_v5 = vadd.f32 %v1263_v2, %v810_v3 }
 0x19b   :  { %v824_v6 = vadd.f32 %v823_v4, %v811_v5 }
 0x19d   :  { %v1174_v41 = vmul.f32 -1.442695, %v824_v6 }
 0x19f   :  { %1268 = vpow2.f32 %v1174_v41 }
 0x1a0   :  { %v812_v7 = vpop.f32.mrf.mxu0  ;;  %v825_v8 = vpop.f32.mrf.mxu1 }
 0x1a5   :  { %v1269_v53 = vpop.eup %1268 }
 0x1a6   :  { %v830_v9 = vadd.f32 1.0, %v1269_v53 }
 0x1a8   :  { %1270 = vrcp.f32 %v830_v9  ;;  %v842_v12 = vand.u32 2147483648, %v830_v9  ;;  %v840_v14 = vand.u32 2147483647, %v830_v9  ;;  %vm836_vm8 = vweird.f32 %v830_v9 }
 0x1aa   :  { %v843_v16 = vor.u32 1.1754944e-38, %v842_v12  ;;  %vm841_vm10 = vcmp.eq.f32.partialorder %v840_v14, 8.507059e+37 }
 0x1ae   :  { %v1271_v24 = vpop.eup %1270 }
 0x1af   :  { %v832_v10 = vmul.f32 %v1271_v24, %v830_v9  ;;  %vm837_vm7 = vweird.f32 %v1271_v24 }
 0x1b0   :  { %vm838_vm9 = vmor %vm836_vm8, %vm837_vm7 }
 0x1b1   :  { %v833_v11 = vsub.f32 1.0, %v832_v10 }
 0x1b3   :  { %v834_v13 = vmul.f32 %v1271_v24, %v833_v11 }
 0x1b5   :  { %v835_v15 = vadd.f32 %v1271_v24, %v834_v13 }
 0x1b7   :  { %v839_v17 = vsel %vm838_vm9, %v1271_v24, %v835_v15 }
 0x1b8   :  { %v844_v18 = vsel %vm841_vm10, %v843_v16, %v839_v17 }
 0x1b9   :  { %846 = vst [vmem:[%s1461_s4] sm:$0xff] %v844_v18 }
 0x1ba   :  { %851 = vsyncpa [#allocation3], 1 }
 0x1bb   :  { %852 = vsyncpa [#allocation5], 1 }
 0x1bc   :  { %853 = vsyncpa [#allocation8], 1 }

</bundles_post_ra>
